<compile_context>
chip_gen: v7x
topology: tpu7x:2x2x1
jax: 0.10.0
libtpu: 0.0.40
codegen_flags: <defaults>
</compile_context>

<pallas_src>
import functools

import jax
import jax.numpy as jnp
from jax import lax
from jax.experimental import pallas as pl
from jax.experimental.pallas import tpu as pltpu


def _mlp_critic_kernel(x_ref, w1_ref, w2_ref, w3_ref, b_ref, o_ref,
                       *, nvs, h1, h2):
    """One batch tile: (TB, F) obs -> (1, TB) values (lane-dense)."""
    wdt = w1_ref.dtype  # matmul dtype (f32 or bf16)

    # In-kernel feature slice of the tile view (static, zero-copy-ish).
    x = x_ref[:, :nvs].astype(wdt)                       # (TB, nvs)

    # Packed biases (kept f32): [b1 | b2 | b3]
    b1 = b_ref[:, :h1]                                   # (1, H1)
    b2 = b_ref[:, h1:h1 + h2]                            # (1, H2)
    b3 = b_ref[:, h1 + h2:]                              # (1, 1)

    a1 = jnp.tanh(
        jnp.dot(x, w1_ref[...], preferred_element_type=jnp.float32) + b1)
    a2 = jnp.tanh(
        jnp.dot(a1.astype(wdt), w2_ref[...],
                preferred_element_type=jnp.float32) + b2)

    # Final H2 -> 1 layer:  (1, H2) . (TB, H2)^T  ->  (1, TB).
    # This avoids the old N=1 matmul whose result was a masked width-1 column;
    # the (1, TB) row is lane-dense and feeds an unmasked vector store.
    v = lax.dot_general(
        w3_ref[...], a2.astype(wdt),
        dimension_numbers=(((1,), (1,)), ((), ())),
        preferred_element_type=jnp.float32) + b3          # (1, TB) f32

    o_ref[...] = v.astype(o_ref.dtype)


def pack_params(params, matmul_dtype=jnp.float32):
    """One-time repack of natural params into the kernel layout.

    - w1, w2 stay [in, out]; cast to matmul dtype (bf16 recommended on v6e/v7x).
    - w3 ([H2, 1]) becomes a (1, H2) row for the lane-dense final layer.
    - all biases concatenated into one (1, H1 + H2 + 1) f32 array.
    """
    return {
        "w1": params["w1"].astype(matmul_dtype),
        "w2": params["w2"].astype(matmul_dtype),
        "w3_row": params["w3"].reshape(1, -1).astype(matmul_dtype),
        "biases": jnp.concatenate(
            [params["b1"], params["b2"], params["b3"]], axis=-1
        ).astype(jnp.float32),
    }


def mlp_critic_forward(obs, packed, num_value_states, *, batch_tile=512):
    """Pallas implementation of MLPCritic.forward.

    obs: [B, F] or [F] float32 (F >= num_value_states).
    packed: output of pack_params().
    Returns value with shape [B] (2-D obs) or scalar [] (1-D obs).
    """
    nvs = int(num_value_states)  # must be a static Python int
    squeeze_batch = obs.ndim == 1
    if squeeze_batch:
        obs = obs[None, :]
    obs = obs.astype(jnp.float32)
    B, F = obs.shape
    assert F >= nvs

    w1, w2 = packed["w1"], packed["w2"]
    w3_row, biases = packed["w3_row"], packed["biases"]
    H1, H2 = w1.shape[1], w2.shape[1]
    NB = biases.shape[1]

    # Batch tile: full batch if it fits in one tile, else a 128-multiple tile
    # (satisfies the (8, 128) block constraints for obs and the (1, B) output).
    assert batch_tile % 128 == 0
    TB = B if B <= batch_tile else batch_tile
    grid = (pl.cdiv(B, TB),)

    kernel = functools.partial(_mlp_critic_kernel, nvs=nvs, h1=H1, h2=H2)

    out = pl.pallas_call(
        kernel,
        out_shape=jax.ShapeDtypeStruct((1, B), jnp.float32),
        grid_spec=pltpu.PrefetchScalarGridSpec(
            num_scalar_prefetch=0,
            grid=grid,
            in_specs=[
                # Activations: tiled over batch, pipelined/double-buffered.
                pl.BlockSpec((TB, F), lambda i: (i, 0)),
                # Weights / biases: VMEM-resident across the whole grid.
                pl.BlockSpec((nvs, H1), lambda i: (0, 0)),
                pl.BlockSpec((H1, H2), lambda i: (0, 0)),
                pl.BlockSpec((1, H2), lambda i: (0, 0)),
                pl.BlockSpec((1, NB), lambda i: (0, 0)),
            ],
            # Lane-dense output row: batch on the lane axis.
            out_specs=pl.BlockSpec((1, TB), lambda i: (0, i)),
        ),
        # Batch tiles are independent -> megacore sharding on v7x.
        # VMEM use is a few hundred KiB at TB=512, well under every gen's
        # scoped default, so no explicit vmem_limit_bytes is needed.
        compiler_params=pltpu.CompilerParams(
            dimension_semantics=("parallel",)),
    )(obs, w1, w2, w3_row, biases)

    value = out[0]                     # (B,)  == torch.squeeze(value, -1)
    if squeeze_batch:
        value = value[0]               # scalar for 1-D obs
    return value


def init_params(key, num_value_states, hidden_sizes):
    """Deterministic synthetic init for the [D0, *hidden, 1] MLP (natural layout)."""
    sizes = [num_value_states] + list(hidden_sizes) + [1]
    params = {}
    for j in range(len(sizes) - 1):
        key, kw, kb = jax.random.split(key, 3)
        bound = 1.0 / jnp.sqrt(sizes[j])
        params[f"w{j + 1}"] = jax.random.uniform(
            kw, (sizes[j], sizes[j + 1]), jnp.float32, -bound, bound)
        params[f"b{j + 1}"] = jax.random.uniform(
            kb, (1, sizes[j + 1]), jnp.float32, -bound, bound)
    return params


def _reference_forward(obs, params, num_value_states):
    squeeze_batch = obs.ndim == 1
    if squeeze_batch:
        obs = obs[None, :]
    x = obs[:, :num_value_states]
    h1 = jnp.tanh(x @ params["w1"] + params["b1"])
    h2 = jnp.tanh(h1 @ params["w2"] + params["b2"])
    v = jnp.squeeze(h2 @ params["w3"] + params["b3"], -1)
    if squeeze_batch:
        v = jnp.squeeze(v, 0)
    return v


if __name__ == "__main__":
    # TODO(synk): activation is hard-coded to tanh (the MLPCritic's configured
    # activation must match); num_value_states must be a static Python int.
    num_value_states = 8
    hidden_sizes = (32, 32)
    obs_dim = 12                     # extra features get sliced off in-kernel

    key = jax.random.PRNGKey(0)
    kp, kx, kb = jax.random.split(key, 3)
    params = init_params(kp, num_value_states, hidden_sizes)

    # ---- small batch, f32 MXU path, tight tolerance -------------------------
    obs = jax.random.normal(kx, (4, obs_dim), jnp.float32)
    packed_f32 = pack_params(params, jnp.float32)

    value = jax.block_until_ready(
        mlp_critic_forward(obs, packed_f32, num_value_states))
    ref = _reference_forward(obs, params, num_value_states)
    assert value.shape == (4,)
    assert jnp.allclose(value, ref, atol=1e-5, rtol=1e-5)

    # 1-D obs path (torch: squeeze(-1) of a (1,) -> scalar)
    value1 = jax.block_until_ready(
        mlp_critic_forward(obs[0], packed_f32, num_value_states))
    ref1 = _reference_forward(obs[0], params, num_value_states)
    assert value1.shape == ()
    assert jnp.allclose(value1, ref1, atol=1e-5, rtol=1e-5)

    # ---- larger batch: exercises the batch grid (3 tiles incl. a partial one)
    #      and the bf16 MXU path (f32 accumulation / epilogue) ----------------
    obs_big = jax.random.normal(kb, (300, obs_dim), jnp.float32)
    packed_bf16 = pack_params(params, jnp.bfloat16)
    value_big = jax.block_until_ready(
        mlp_critic_forward(obs_big, packed_bf16, num_value_states,
                           batch_tile=128))
    ref_big = _reference_forward(obs_big, params, num_value_states)
    assert value_big.shape == (300,)
    assert jnp.allclose(value_big, ref_big, atol=5e-2, rtol=5e-2)

    print("KERNEL_OK")
</pallas_src>

<mosaic_0001>
module attributes {stable_mosaic.version = 11 : i64} {
  func.func @_mlp_critic_kernel(%arg0: i32, %arg1: memref<4x12xf32, #tpu.memory_space<vmem>>, %arg2: memref<8x32xf32, #tpu.memory_space<vmem>>, %arg3: memref<32x32xf32, #tpu.memory_space<vmem>>, %arg4: memref<1x32xf32, #tpu.memory_space<vmem>>, %arg5: memref<1x65xf32, #tpu.memory_space<vmem>>, %arg6: memref<1x4xf32, #tpu.memory_space<vmem>>) attributes {dimension_semantics = [#tpu.dimension_semantics<parallel>], iteration_bounds = array<i64: 1>, scalar_prefetch = 0 : i64, scratch_operands = 0 : i64, tpu.core_type = #tpu.core_type<tc>, window_params = [{transform_indices = @transform_0, window_bounds = array<i64: 4, 12>}, {pipeline_mode = #tpu.pipeline_mode<synchronous>, transform_indices = @transform_1, window_bounds = array<i64: 8, 32>}, {pipeline_mode = #tpu.pipeline_mode<synchronous>, transform_indices = @transform_2, window_bounds = array<i64: 32, 32>}, {pipeline_mode = #tpu.pipeline_mode<synchronous>, transform_indices = @transform_3, window_bounds = array<i64: 1, 32>}, {pipeline_mode = #tpu.pipeline_mode<synchronous>, transform_indices = @transform_4, window_bounds = array<i64: 1, 65>}, {transform_indices = @transform_5, window_bounds = array<i64: 1, 4>}]} {
    %c0 = arith.constant 0 : index
    %c0_0 = arith.constant 0 : index
    %0 = vector.load %arg1[%c0, %c0_0] : memref<4x12xf32, #tpu.memory_space<vmem>>, vector<4x8xf32>
    %c0_1 = arith.constant 0 : index
    %c0_2 = arith.constant 0 : index
    %1 = vector.load %arg5[%c0_1, %c0_2] : memref<1x65xf32, #tpu.memory_space<vmem>>, vector<1x32xf32>
    %c0_3 = arith.constant 0 : index
    %c32 = arith.constant 32 : index
    %2 = vector.load %arg5[%c0_3, %c32] : memref<1x65xf32, #tpu.memory_space<vmem>>, vector<1x32xf32>
    %c0_4 = arith.constant 0 : index
    %c64 = arith.constant 64 : index
    %3 = vector.load %arg5[%c0_4, %c64] : memref<1x65xf32, #tpu.memory_space<vmem>>, vector<1x1xf32>
    %c0_5 = arith.constant 0 : index
    %c0_6 = arith.constant 0 : index
    %4 = vector.load %arg2[%c0_5, %c0_6] : memref<8x32xf32, #tpu.memory_space<vmem>>, vector<8x32xf32>
    %cst = arith.constant dense<0.000000e+00> : vector<4x32xf32>
    %5 = tpu.matmul %0, %4, %cst {dimension_numbers = #tpu.dot_dimension_numbers<[1], [0], [0], [1], [0, 0, 1, 1], [], []>} : vector<4x8xf32>, vector<8x32xf32>, vector<4x32xf32> -> vector<4x32xf32>
    %6 = vector.broadcast %1 : vector<1x32xf32> to vector<4x32xf32>
    %7 = arith.addf %5, %6 : vector<4x32xf32>
    %8 = math.tanh %7 : vector<4x32xf32>
    %c0_7 = arith.constant 0 : index
    %c0_8 = arith.constant 0 : index
    %9 = vector.load %arg3[%c0_7, %c0_8] : memref<32x32xf32, #tpu.memory_space<vmem>>, vector<32x32xf32>
    %cst_9 = arith.constant dense<0.000000e+00> : vector<4x32xf32>
    %10 = tpu.matmul %8, %9, %cst_9 {dimension_numbers = #tpu.dot_dimension_numbers<[1], [0], [0], [1], [0, 0, 1, 1], [], []>} : vector<4x32xf32>, vector<32x32xf32>, vector<4x32xf32> -> vector<4x32xf32>
    %11 = vector.broadcast %2 : vector<1x32xf32> to vector<4x32xf32>
    %12 = arith.addf %10, %11 : vector<4x32xf32>
    %13 = math.tanh %12 : vector<4x32xf32>
    %c0_10 = arith.constant 0 : index
    %c0_11 = arith.constant 0 : index
    %14 = vector.load %arg4[%c0_10, %c0_11] : memref<1x32xf32, #tpu.memory_space<vmem>>, vector<1x32xf32>
    %cst_12 = arith.constant dense<0.000000e+00> : vector<1x4xf32>
    %15 = tpu.matmul %14, %13, %cst_12 {dimension_numbers = #tpu.dot_dimension_numbers<[1], [1], [0], [0], [0, 0, 1, 0], [], []>} : vector<1x32xf32>, vector<4x32xf32>, vector<1x4xf32> -> vector<1x4xf32>
    %16 = vector.broadcast %3 : vector<1x1xf32> to vector<1x4xf32>
    %17 = arith.addf %15, %16 : vector<1x4xf32>
    %c0_13 = arith.constant 0 : index
    %c0_14 = arith.constant 0 : index
    %18 = vector.load %arg6[%c0_13, %c0_14] : memref<1x4xf32, #tpu.memory_space<vmem>>, vector<1x4xf32>
    tpu.vector_store %arg6[%c0_13, %c0_14], %17 {strides = array<i32>} : memref<1x4xf32, #tpu.memory_space<vmem>>, vector<1x4xf32>,
    return
  }
  func.func @transform_0(%arg0: i32) -> (i32, i32) {
    %c0_i32 = arith.constant 0 : i32
    %c0_i32_0 = arith.constant 0 : i32
    return %arg0, %c0_i32 : i32, i32
  }
  func.func @transform_1(%arg0: i32) -> (i32, i32) {
    %c0_i32 = arith.constant 0 : i32
    %c0_i32_0 = arith.constant 0 : i32
    %c0_i32_1 = arith.constant 0 : i32
    return %c0_i32, %c0_i32_0 : i32, i32
  }
  func.func @transform_2(%arg0: i32) -> (i32, i32) {
    %c0_i32 = arith.constant 0 : i32
    %c0_i32_0 = arith.constant 0 : i32
    %c0_i32_1 = arith.constant 0 : i32
    return %c0_i32, %c0_i32_0 : i32, i32
  }
  func.func @transform_3(%arg0: i32) -> (i32, i32) {
    %c0_i32 = arith.constant 0 : i32
    %c0_i32_0 = arith.constant 0 : i32
    %c0_i32_1 = arith.constant 0 : i32
    return %c0_i32, %c0_i32_0 : i32, i32
  }
  func.func @transform_4(%arg0: i32) -> (i32, i32) {
    %c0_i32 = arith.constant 0 : i32
    %c0_i32_0 = arith.constant 0 : i32
    %c0_i32_1 = arith.constant 0 : i32
    return %c0_i32, %c0_i32_0 : i32, i32
  }
  func.func @transform_5(%arg0: i32) -> (i32, i32) {
    %c0_i32 = arith.constant 0 : i32
    %c0_i32_0 = arith.constant 0 : i32
    return %c0_i32, %arg0 : i32, i32
  }
}

</mosaic_0001>

<bundles_post_ra>
// kernel: tpu_custom_call.1
= control target key start
LH: loop header
LB: loop body
LE: loop exit
PB: predicated region body
PF: predicated region fallthrough
CT: control target
= control target key end

     0   :  { %10 = vsyncpa [#allocation3], 0  ;;  %s572_s0 = inlined_call_operand.hbm [shape: f32[4,12], index: 0, kind: input, shape index: {}]   ;;  %s573_s1 = inlined_call_operand.hbm [shape: f32[8,32], index: 1, kind: input, shape index: {}]   ;;  %s574_s2 = inlined_call_operand.hbm [shape: f32[32,32], index: 2, kind: input, shape index: {}]   ;;  %s575_s3 = inlined_call_operand.vmem [shape: f32[1,32], index: 3, kind: input, shape index: {}]   ;;  %s576_s4 = inlined_call_operand.vmem [shape: f32[1,65], index: 4, kind: input, shape index: {}]   ;;  %s577_s5 = inlined_call_operand.hbm [shape: f32[1,4], index: 5, kind: output, shape index: {}]  }
   0x1   :  { %11 = vsyncpa [#allocation6], 0 }
   0x2   :  { %12 = vsyncpa [#allocation4], 0  ;;  %s477_s18 = smov [#allocation5]   ;;  %s478_s20 = smov [#allocation2]  }
   0x3   :  { %s29_s19 = sshll.u32 %s477_s18, 4  ;;  %s19_s21 = sshll.u32 %s478_s20, 4  ;;  %s30_s19 = int_to_ptr.vmem [resolvable:$true] %s29_s19  ;;  %s20_s21 = int_to_ptr.vmem [resolvable:$true] %s19_s21 }
   0x4   :  { %s383_s24 = scalar_lea.hbm %s573_s1, 128 }
   0x5   :  { %p384_p0 = scmp.ne.s32.totalorder %s573_s1, %s383_s24  ;;  %p387_p1 = scmp.lt.u32.totalorder %s383_s24, %s573_s1 }
   0x7   :  { %p389_p2 = pnand %p387_p1, %p384_p0 }
   0x9   :  { %392 = shalt.err (!%p389_p2)
}
   0xa   :  { %s393_s29 = scalar_lea.vmem %s30_s19, 128  ;;  %p398_p4 = scmp.lt.s32.totalorder %s30_s19, %s30_s19 }
   0xb   :  { %p394_p3 = scmp.ne.s32.totalorder %s30_s19, %s393_s29  ;;  %p399_p5 = scmp.lt.s32.totalorder %s393_s29, %s393_s29 }
   0xd   :  { %p400_p6 = por %p399_p5, %p398_p4 }
   0xf   :  { %p401_p7 = pnand %p400_p6, %p394_p3 }
  0x11   :  { %404 = shalt.err (!%p401_p7)
}
  0x12   :  { %32 = dma.hbm_to_vmem [thread:$0]  %s573_s1, 128, %s30_s19, [#allocation6]  }
  0x13   :  { %s405_s9 = scalar_lea.hbm %s572_s0, 64 }
  0x14   :  { %p406_p8 = scmp.ne.s32.totalorder %s572_s0, %s405_s9  ;;  %p409_p9 = scmp.lt.u32.totalorder %s405_s9, %s572_s0 }
  0x16   :  { %p411_p10 = pnand %p409_p9, %p406_p8 }
  0x18   :  { %414 = shalt.err (!%p411_p10)
}
  0x19   :  { %s415_s14 = scalar_lea.vmem %s20_s21, 64  ;;  %p420_p12 = scmp.lt.s32.totalorder %s20_s21, %s20_s21 }
  0x1a   :  { %p416_p11 = scmp.ne.s32.totalorder %s20_s21, %s415_s14  ;;  %p421_p13 = scmp.lt.s32.totalorder %s415_s14, %s415_s14 }
  0x1c   :  { %p422_p0 = por %p421_p13, %p420_p12 }
  0x1e   :  { %p423_p1 = pnand %p422_p0, %p416_p11 }
  0x20   :  { %426 = shalt.err (!%p423_p1)
}
  0x21   :  { %22 = dma.hbm_to_vmem [thread:$0]  %s572_s0, 64, %s20_s21, [#allocation3]  }
  0x22   :  { %s479_s16 = smov [#allocation7]   ;;  %s427_s20 = scalar_lea.hbm %s574_s2, 512 }
  0x23   :  { %s38_s17 = sshll.u32 %s479_s16, 4  ;;  %p428_p2 = scmp.ne.s32.totalorder %s574_s2, %s427_s20  ;;  %s39_s17 = int_to_ptr.vmem [resolvable:$true] %s38_s17 }
  0x24   :  { %p431_p3 = scmp.lt.u32.totalorder %s427_s20, %s574_s2 }
  0x26   :  { %p433_p4 = pnand %p431_p3, %p428_p2 }
  0x28   :  { %436 = shalt.err (!%p433_p4)
}
  0x29   :  { %s437_s26 = scalar_lea.vmem %s39_s17, 512  ;;  %p442_p6 = scmp.lt.s32.totalorder %s39_s17, %s39_s17 }
  0x2a   :  { %p438_p5 = scmp.ne.s32.totalorder %s39_s17, %s437_s26  ;;  %p443_p7 = scmp.lt.s32.totalorder %s437_s26, %s437_s26 }
  0x2c   :  { %p444_p8 = por %p443_p7, %p442_p6 }
  0x2e   :  { %p445_p9 = pnand %p444_p8, %p438_p5 }
  0x30   :  { %448 = shalt.err (!%p445_p9)
}
  0x31   :  { %s480_s0 = smov 128   ;;  %s481_s21 = smov 8  }
  0x32   :  { %44 = dma.hbm_to_vmem [thread:$0]  %s574_s2, 512, %s39_s17, [#allocation6], %s480_s0, %s480_s0, %s481_s21  }
  0x33   :  { %471 = dma.done.wait [#allocation3], 64  }
  0x34   :  { %472 = vsyncadd [#allocation3], 4294967232 }
  0x35   :  { %473 = dma.done.wait [#allocation6], 640  }
  0x36   :  { %474 = vsyncadd [#allocation6], 4294966656  ;;  %v482_v0 = vmov 0.0   ;;  %vm483_vm0 = vmmov 0   ;;  %vm67_vm1 = vcmask 64512   ;;  %v60_v1 = vld [vmem:[#allocation5] sm:$0xff]  ;;  %v62_v3 = vlaneseq }
  0x37   :  { %340 = vmatprep.subr.mxu0 %v482_v0  ;;  %342 = vmatprep.mubr.msk.f32.mxu0 %vm483_vm0, %v482_v0  ;;  %v58_v2 = vld [vmem:[#allocation2] sm:$0xf]  ;;  %v142_v4 = vld [vmem:[#allocation7] sm:$0xff]  ;;  %v143_v5 = vld [vmem:[#allocation7 + $0x8] sm:$0xff]  ;;  %v484_v7 = vmov 0.0|0.0   ;;  %s485_s30 = smov 96  }
  0x38   :  { %353 = vmatprep.mubr.msk.f32.mxu1 %vm483_vm0, %v482_v0  ;;  %341 = vmatpush3.msra.mxu0 %v60_v1  ;;  %v144_v6 = vld [vmem:[#allocation7 + $0x10] sm:$0xff]  ;;  %v362_v8 = vpack.c.bf16 %v143_v5, %v142_v4  ;;  %v145_v9 = vld [vmem:[#allocation7 + $0x18] sm:$0xff]  ;;  %v63_v10 = vshrl.u32 %v62_v3, 7  ;;  %vm149_vm2 = vcmask 261120   ;;  %v486_v19 = vmov 64   ;;  %s487_s7 = smov [#allocation8]  }
  0x39   :  { %343 = vmatmul.mubr.msk.f32.vlgmr.msra.gmra.mrb[0].mxu0 %vm67_vm1, %v58_v2  ;;  %356 = vmatprep.subr.mxu0 %v482_v0  ;;  %v365_v11 = vpack.c.bf16 %v145_v9, %v144_v6  ;;  %v59_v13 = vld [vmem:[%s576_s4] sm:$0x1]  ;;  %s317_s8 = sshll.u32 %s487_s7, 4  ;;  %vm309_vm3 = vcmask 24576   ;;  %s318_s8 = int_to_ptr.vmem [resolvable:$true] %s317_s8 }
  0x3a   :  { %358 = vmatprep.mubr.msk.f32.mxu0 %vm483_vm0, %v482_v0  ;;  %361 = vmatprep.subr.bf16.mxu1 %v484_v7  ;;  %v64_v12 = vsub.s32 0, %v63_v10  ;;  %v224_v25 = vld [vmem:[%s575_s3] sm:$0x1]  ;;  %s449_s9 = scalar_lea.vmem %s318_s8, 16  ;;  %s453_s10 = scalar_lea.vmem %s318_s8, 32 }
  0x3b   :  { %363 = vmatpush3.bf16.msra.mxu1 %v362_v8  ;;  %378 = vset.pattern.permute.xlu0 %v486_v19  ;;  %p450_p10 = scmp.ne.s32.totalorder %s318_s8, %s449_s9  ;;  %p454_p11 = scmp.lt.s32.totalorder %s318_s8, %s318_s8 }
  0x3c   :  { %364 = vmatprep.subr.bf16.mxu1 %v484_v7  ;;  %v65_v14 = vrot.slane %v59_v13, %v64_v12  ;;  %p455_p12 = scmp.lt.s32.totalorder %s453_s10, %s449_s9 }
  0x3e   :  { %146 = vrot.lane.b32.xlu0 %v65_v14, %s485_s30  ;;  %p456_p13 = por %p455_p12, %p454_p11 }
  0x3f   :  { %366 = vmatpush3.bf16.msra.mxu1 %v365_v11 }
  0x40   :  { %p457_p0 = pnand %p456_p13, %p450_p10 }
  0x42   :  { %226 = vperm.xlu0 %378, %v59_v13  }
  0xb0   :  { %v147_v20 = vpop.permute.xlu0 %146 }
  0xc1   :  { %v227_v26 = vpop.permute.xlu0 %226 }
  0xc2   :  { %v232_v27 = vrot.slane %v227_v26, %v64_v12 }
 0x10c   :  { %v137_v15 = vpop.f32.mrb[0].mxu0 }
 0x10d   :  { %v138_v16 = vadd.f32 %v137_v15, %v65_v14  ;;  %v344_v17 = vpop.f32.mrb[1].mxu0 }
 0x10f   :  { %379 = vtanh.f32 %v138_v16 }
 0x119   :  { %v380_v18 = vpop.eup %379 }
 0x11a   :  { %354 = vmatmul.mubr.msk.f32.vlgmr.msra.gmra.mrb[0].mxu1 %vm149_vm2, %v380_v18 }
 0x1ed   :  { %v219_v21 = vpop.f32.mrb[0].mxu1 }
 0x1ee   :  { %v220_v22 = vadd.f32 %v219_v21, %v147_v20  ;;  %v355_v23 = vpop.f32.mrb[1].mxu1 }
 0x1f0   :  { %381 = vtanh.f32 %v220_v22 }
 0x1fa   :  { %v382_v24 = vpop.eup %381 }
 0x1fb   :  { %357 = vmatpush3.xpose.msk.msra.mxu0 %vm149_vm2, %v382_v24 }
 0x1fe   :  { %359 = vmatmul.mubr.msk.f32.vlgmr.msra.gmra.mrb[2].mxu0 %vm149_vm2, %v224_v25 }
 0x2d1   :  { %v305_v28 = vpop.f32.mrb[2].mxu0 }
 0x2d2   :  { %v306_v29 = vadd.f32 %v305_v28, %v232_v27  ;;  %v360_v30 = vpop.f32.mrb[3].mxu0 }
 0x2d4   :  { %310 = vst.msk [vmem:[#allocation8] sm:$0x1] %vm309_vm3, %v306_v29 }
 0x2d5   :  { %460 = shalt.err (!%p457_p0)
}
 0x2d6   :  { %s461_s12 = scalar_lea.hbm %s577_s5, 16 }
 0x2d7   :  { %p462_p1 = scmp.ne.s32.totalorder %s577_s5, %s461_s12  ;;  %p465_p2 = scmp.lt.u32.totalorder %s461_s12, %s577_s5 }
 0x2d9   :  { %p467_p3 = pnand %p465_p2, %p462_p1 }
 0x2db   :  { %470 = shalt.err (!%p467_p3)
}
 0x2dc   :  { %320 = dma.vmem_to_hbm [thread:$0]  %s318_s8, 16, %s577_s5, [#allocation4]  }
 0x2dd   :  { %475 = dma.done.wait [#allocation4], 16  }
 0x2de   :  { %476 = vsyncadd [#allocation4], 4294967280 }
 0x2df   :  { %324 = vsyncpa [#allocation3], 1 }
 0x2e0   :  { %325 = vsyncpa [#allocation6], 1 }
 0x2e1   :  { %326 = vsyncpa [#allocation4], 1 }

</bundles_post_ra>
